<compile_context>
chip_gen: v6e
topology: v6e:2x2x1
jax: 0.10.0
libtpu: 0.0.40
codegen_flags: <defaults>
</compile_context>

<pallas_src>
from functools import partial

import jax
import jax.numpy as jnp
from jax.experimental import pallas as pl
from jax.experimental.pallas import tpu as pltpu


def _round_up(x, m):
    return (x + m - 1) // m * m


# ------------------------------- pass 1 -------------------------------------
def _conv_stats_kernel(x_ref, w_ref, s1_ref, s2_ref):
    """Per-tile BN partial statistics of the conv output (stats only).

    x_ref:  (K, TILE)  bf16   im2col columns of this tile (lane-dense on TILE)
    w_ref:  (Cs, K)    bf16   flattened weights, resident across grid steps
    s1_ref: (Cs, 1)    f32    per-channel partial sum
    s2_ref: (Cs, 1)    f32    per-channel partial sum of squares
    """
    conv = jnp.dot(w_ref[...], x_ref[...],
                   preferred_element_type=jnp.float32)          # (Cs, TILE)
    s1_ref[...] = jnp.sum(conv, axis=1, keepdims=True)          # XLU lane reduce
    s2_ref[...] = jnp.sum(conv * conv, axis=1, keepdims=True)


# ------------------------------- pass 2 -------------------------------------
def _conv_bn_act_kernel(x_ref, w_ref, scale_ref, shift_ref, out_ref):
    """out = relu(conv * scale + shift); conv recomputed (cheap, small K).

    x_ref:     (K, TILE)  bf16
    w_ref:     (Cs, K)    bf16
    scale_ref: (Cs, 1)    f32
    shift_ref: (Cs, 1)    f32
    out_ref:   (Cs, TILE) f32   -> NCHW output block (lane-dense stores)
    """
    conv = jnp.dot(w_ref[...], x_ref[...],
                   preferred_element_type=jnp.float32)          # (Cs, TILE)
    y = conv * scale_ref[...] + shift_ref[...]
    out_ref[...] = jnp.maximum(y, 0.0).astype(out_ref.dtype)


def conv2d_bn_act(x_nchw, weight, gamma, beta, *, stride=1, padding=0, eps=1e-5):
    """x_nchw: (N, Cin, H, W); weight: (Cout, Cin, KH, KW) (PyTorch layouts)."""
    N, Cin, H, W = x_nchw.shape
    Cout, Cin_w, KH, KW = weight.shape
    assert Cin == Cin_w
    OH = (H + 2 * padding - KH) // stride + 1
    OW = (W + 2 * padding - KW) // stride + 1
    M_img = OH * OW                      # output pixels per image (lane dim)
    M = N * M_img                        # total BN reduction count
    K = Cin * KH * KW                    # matmul contraction dim
    Cs = _round_up(Cout, 8)              # Cout on sublanes -> pad to 8, not 128

    # --- wrapper-side im2col (small-Cin stem path), directly in NCHW order ---
    # x_col[n, (cin, kh, kw), (oh, ow)] = x_pad[n, cin, oh*s + kh, ow*s + kw]
    # Note: for large Cin this 9x HBM blow-up would call for in-kernel gather /
    # K-tiling instead; this path is specialized for small-Cin layers.
    x_pad = jnp.pad(x_nchw, ((0, 0), (0, 0),
                             (padding, padding), (padding, padding)))
    slabs = []
    for kh in range(KH):
        for kw in range(KW):
            slabs.append(x_pad[:, :,
                                kh:kh + (OH - 1) * stride + 1:stride,
                                kw:kw + (OW - 1) * stride + 1:stride])
    x_col = jnp.stack(slabs, axis=2)                 # (N, Cin, KH*KW, OH, OW)
    x_col = x_col.reshape(N, K, M_img).astype(jnp.bfloat16)

    # Lane tile over output pixels (1024-2048 lanes when the image allows it).
    tile = min(2048, _round_up(M_img, 128))
    Mp = _round_up(M_img, tile)
    if Mp != M_img:
        # Zero columns: conv there is exactly 0 -> contributes 0 to s1/s2, and
        # the padded region is sliced off the output at the end.
        x_col = jnp.pad(x_col, ((0, 0), (0, 0), (0, Mp - M_img)))
    n_tiles = Mp // tile

    # weight (Cout, Cin, KH, KW) -> (Cs, K): K ordering matches x_col, so this
    # is a pure reshape (no transpose), plus sublane zero-padding of Cout.
    w_t = weight.reshape(Cout, K)
    if Cs != Cout:
        w_t = jnp.pad(w_t, ((0, Cs - Cout), (0, 0)))
    w_t = w_t.astype(jnp.bfloat16)

    flops_per_pass = 2 * N * Mp * K * Cs

    # --- pass 1: stats only (no conv slab written to HBM) --------------------
    s1_p, s2_p = pl.pallas_call(
        _conv_stats_kernel,
        grid=(N, n_tiles),
        in_specs=[
            pl.BlockSpec((None, K, tile), lambda n, t: (n, 0, t)),
            pl.BlockSpec((Cs, K), lambda n, t: (0, 0)),
        ],
        out_specs=(
            pl.BlockSpec((None, None, Cs, 1), lambda n, t: (n, t, 0, 0)),
            pl.BlockSpec((None, None, Cs, 1), lambda n, t: (n, t, 0, 0)),
        ),
        out_shape=(
            jax.ShapeDtypeStruct((N, n_tiles, Cs, 1), jnp.float32),
            jax.ShapeDtypeStruct((N, n_tiles, Cs, 1), jnp.float32),
        ),
        compiler_params=pltpu.CompilerParams(
            dimension_semantics=("parallel", "parallel"),
            vmem_limit_bytes=32 * 1024 * 1024,
        ),
        cost_estimate=pl.CostEstimate(
            flops=flops_per_pass,
            transcendentals=0,
            bytes_accessed=x_col.size * 2 + w_t.size * 2
            + 2 * N * n_tiles * Cs * 4,
        ),
    )(x_col, w_t)

    # --- finalize BN: global batch stats -> one per-channel scale/shift ------
    s1 = jnp.sum(s1_p[..., 0], axis=(0, 1))          # (Cs,)
    s2 = jnp.sum(s2_p[..., 0], axis=(0, 1))
    mean = s1 / M
    var = s2 / M - mean * mean        # biased batch variance (BN train mode), f32
    inv_std = jax.lax.rsqrt(var + eps)
    gamma_p = jnp.pad(gamma.astype(jnp.float32), (0, Cs - Cout))
    beta_p = jnp.pad(beta.astype(jnp.float32), (0, Cs - Cout))
    scale = (gamma_p * inv_std).reshape(Cs, 1)
    shift = (beta_p - mean * gamma_p * inv_std).reshape(Cs, 1)

    # --- pass 2: fused conv recompute + scale/shift + ReLU, NCHW output ------
    out = pl.pallas_call(
        _conv_bn_act_kernel,
        grid=(N, n_tiles),
        in_specs=[
            pl.BlockSpec((None, K, tile), lambda n, t: (n, 0, t)),
            pl.BlockSpec((Cs, K), lambda n, t: (0, 0)),
            pl.BlockSpec((Cs, 1), lambda n, t: (0, 0)),
            pl.BlockSpec((Cs, 1), lambda n, t: (0, 0)),
        ],
        out_specs=pl.BlockSpec((None, Cs, tile), lambda n, t: (n, 0, t)),
        out_shape=jax.ShapeDtypeStruct((N, Cs, Mp), jnp.float32),
        compiler_params=pltpu.CompilerParams(
            dimension_semantics=("parallel", "parallel"),
            vmem_limit_bytes=32 * 1024 * 1024,
        ),
        cost_estimate=pl.CostEstimate(
            flops=flops_per_pass + 3 * N * Mp * Cs,
            transcendentals=0,
            bytes_accessed=x_col.size * 2 + w_t.size * 2
            + N * Cs * Mp * 4 + 2 * Cs * 4,
        ),
    )(x_col, w_t, scale, shift)

    # Already NCHW; just drop channel / pixel padding.
    return out[:, :Cout, :M_img].reshape(N, Cout, OH, OW)


def _reference(x_nchw, weight, gamma, beta, *, stride, padding, eps):
    """Pure-JAX reference with the same MXU numerics (bf16 operands, f32 acc)."""
    conv = jax.lax.conv_general_dilated(
        x_nchw.astype(jnp.bfloat16), weight.astype(jnp.bfloat16),
        window_strides=(stride, stride),
        padding=[(padding, padding), (padding, padding)],
        dimension_numbers=("NCHW", "OIHW", "NCHW"),
        preferred_element_type=jnp.float32)
    mean = jnp.mean(conv, axis=(0, 2, 3), keepdims=True)
    var = jnp.mean((conv - mean) ** 2, axis=(0, 2, 3), keepdims=True)
    y = (conv - mean) * jax.lax.rsqrt(var + eps)
    y = y * gamma.reshape(1, -1, 1, 1) + beta.reshape(1, -1, 1, 1)
    return jnp.maximum(y, 0.0)


if __name__ == "__main__":
    key = jax.random.PRNGKey(0)
    k_x, k_w = jax.random.split(key)

    # Small shapes consistent with the module's forward.
    N, Cin, H, W = 2, 4, 16, 16
    Cout, KH, KW = 8, 3, 3
    stride, padding, eps = 1, 1, 1e-5

    x = jax.random.normal(k_x, (N, Cin, H, W), dtype=jnp.float32)

    # Deterministic parameter init (shapes per nn.Conv2d / nn.BatchNorm2d __init__).
    fan_in = Cin * KH * KW
    bound = 1.0 / (fan_in ** 0.5)
    weight = jax.random.uniform(k_w, (Cout, Cin, KH, KW),
                                minval=-bound, maxval=bound, dtype=jnp.float32)
    gamma = jnp.ones((Cout,), jnp.float32)   # BatchNorm2d.weight default
    beta = jnp.zeros((Cout,), jnp.float32)   # BatchNorm2d.bias default

    fn = jax.jit(partial(conv2d_bn_act, stride=stride, padding=padding, eps=eps))
    out = jax.block_until_ready(fn(x, weight, gamma, beta))

    ref = _reference(x, weight, gamma, beta, stride=stride, padding=padding, eps=eps)
    assert out.shape == (N, Cout, H, W)
    assert jnp.allclose(out, ref, atol=1e-2, rtol=1e-2), \
        float(jnp.max(jnp.abs(out - ref)))

    print("KERNEL_OK")
</pallas_src>

<mosaic_0001>
module attributes {stable_mosaic.version = 11 : i64} {
  func.func @_conv_stats_kernel(%arg0: i32, %arg1: i32, %arg2: memref<1x36x256xbf16, #tpu.memory_space<vmem>>, %arg3: memref<8x36xbf16, #tpu.memory_space<vmem>>, %arg4: memref<1x1x8x1xf32, #tpu.memory_space<vmem>>, %arg5: memref<1x1x8x1xf32, #tpu.memory_space<vmem>>) attributes {dimension_semantics = [#tpu.dimension_semantics<parallel>, #tpu.dimension_semantics<parallel>], iteration_bounds = array<i64: 2, 1>, scalar_prefetch = 0 : i64, scratch_operands = 0 : i64, tpu.core_type = #tpu.core_type<tc>, window_params = [{transform_indices = @transform_0, window_bounds = array<i64: 1, 36, 256>}, {pipeline_mode = #tpu.pipeline_mode<synchronous>, transform_indices = @transform_1, window_bounds = array<i64: 8, 36>}, {transform_indices = @transform_2, window_bounds = array<i64: 1, 1, 8, 1>}, {transform_indices = @transform_3, window_bounds = array<i64: 1, 1, 8, 1>}]} {
    %c0 = arith.constant 0 : index
    %c0_0 = arith.constant 0 : index
    %0 = vector.load %arg3[%c0, %c0_0] : memref<8x36xbf16, #tpu.memory_space<vmem>>, vector<8x36xbf16>
    %c0_1 = arith.constant 0 : index
    %c0_2 = arith.constant 0 : index
    %c0_3 = arith.constant 0 : index
    %1 = vector.load %arg2[%c0_1, %c0_2, %c0_3] : memref<1x36x256xbf16, #tpu.memory_space<vmem>>, vector<1x36x256xbf16>
    %2 = vector.shape_cast %1 : vector<1x36x256xbf16> to vector<36x256xbf16>
    %cst = arith.constant dense<0.000000e+00> : vector<8x256xf32>
    %3 = tpu.matmul %0, %2, %cst {dimension_numbers = #tpu.dot_dimension_numbers<[1], [0], [0], [1], [0, 0, 1, 1], [], []>} : vector<8x36xbf16>, vector<36x256xbf16>, vector<8x256xf32> -> vector<8x256xf32>
    %cst_4 = arith.constant dense<0.000000e+00> : vector<8xf32>
    %4 = vector.multi_reduction <add>, %3, %cst_4 [1] : vector<8x256xf32> to vector<8xf32>
    %5 = vector.shape_cast %4 : vector<8xf32> to vector<8x1xf32>
    %c0_5 = arith.constant 0 : index
    %c0_6 = arith.constant 0 : index
    %c0_7 = arith.constant 0 : index
    %c0_8 = arith.constant 0 : index
    %6 = vector.load %arg4[%c0_5, %c0_6, %c0_7, %c0_8] : memref<1x1x8x1xf32, #tpu.memory_space<vmem>>, vector<1x1x8x1xf32>
    %7 = vector.shape_cast %6 : vector<1x1x8x1xf32> to vector<8x1xf32>
    %8 = vector.shape_cast %5 : vector<8x1xf32> to vector<1x1x8x1xf32>
    tpu.vector_store %arg4[%c0_5, %c0_6, %c0_7, %c0_8], %8 {strides = array<i32>} : memref<1x1x8x1xf32, #tpu.memory_space<vmem>>, vector<1x1x8x1xf32>,
    %9 = arith.mulf %3, %3 : vector<8x256xf32>
    %cst_9 = arith.constant dense<0.000000e+00> : vector<8xf32>
    %10 = vector.multi_reduction <add>, %9, %cst_9 [1] : vector<8x256xf32> to vector<8xf32>
    %11 = vector.shape_cast %10 : vector<8xf32> to vector<8x1xf32>
    %c0_10 = arith.constant 0 : index
    %c0_11 = arith.constant 0 : index
    %c0_12 = arith.constant 0 : index
    %c0_13 = arith.constant 0 : index
    %12 = vector.load %arg5[%c0_10, %c0_11, %c0_12, %c0_13] : memref<1x1x8x1xf32, #tpu.memory_space<vmem>>, vector<1x1x8x1xf32>
    %13 = vector.shape_cast %12 : vector<1x1x8x1xf32> to vector<8x1xf32>
    %14 = vector.shape_cast %11 : vector<8x1xf32> to vector<1x1x8x1xf32>
    tpu.vector_store %arg5[%c0_10, %c0_11, %c0_12, %c0_13], %14 {strides = array<i32>} : memref<1x1x8x1xf32, #tpu.memory_space<vmem>>, vector<1x1x8x1xf32>,
    return
  }
  func.func @transform_0(%arg0: i32, %arg1: i32) -> (i32, i32, i32) {
    %c0_i32 = arith.constant 0 : i32
    %c0_i32_0 = arith.constant 0 : i32
    return %arg0, %c0_i32, %arg1 : i32, i32, i32
  }
  func.func @transform_1(%arg0: i32, %arg1: i32) -> (i32, i32) {
    %c0_i32 = arith.constant 0 : i32
    %c0_i32_0 = arith.constant 0 : i32
    %c0_i32_1 = arith.constant 0 : i32
    return %c0_i32, %c0_i32_0 : i32, i32
  }
  func.func @transform_2(%arg0: i32, %arg1: i32) -> (i32, i32, i32, i32) {
    %c0_i32 = arith.constant 0 : i32
    %c0_i32_0 = arith.constant 0 : i32
    %c0_i32_1 = arith.constant 0 : i32
    return %arg0, %arg1, %c0_i32, %c0_i32_0 : i32, i32, i32, i32
  }
  func.func @transform_3(%arg0: i32, %arg1: i32) -> (i32, i32, i32, i32) {
    %c0_i32 = arith.constant 0 : i32
    %c0_i32_0 = arith.constant 0 : i32
    %c0_i32_1 = arith.constant 0 : i32
    return %arg0, %arg1, %c0_i32, %c0_i32_0 : i32, i32, i32, i32
  }
}

module attributes {stable_mosaic.version = 11 : i64} {
  func.func @_conv_bn_act_kernel(%arg0: i32, %arg1: i32, %arg2: memref<1x36x256xbf16, #tpu.memory_space<vmem>>, %arg3: memref<8x36xbf16, #tpu.memory_space<vmem>>, %arg4: memref<8x1xf32, #tpu.memory_space<vmem>>, %arg5: memref<8x1xf32, #tpu.memory_space<vmem>>, %arg6: memref<1x8x256xf32, #tpu.memory_space<vmem>>) attributes {dimension_semantics = [#tpu.dimension_semantics<parallel>, #tpu.dimension_semantics<parallel>], iteration_bounds = array<i64: 2, 1>, scalar_prefetch = 0 : i64, scratch_operands = 0 : i64, tpu.core_type = #tpu.core_type<tc>, window_params = [{transform_indices = @transform_0, window_bounds = array<i64: 1, 36, 256>}, {pipeline_mode = #tpu.pipeline_mode<synchronous>, transform_indices = @transform_1, window_bounds = array<i64: 8, 36>}, {pipeline_mode = #tpu.pipeline_mode<synchronous>, transform_indices = @transform_2, window_bounds = array<i64: 8, 1>}, {pipeline_mode = #tpu.pipeline_mode<synchronous>, transform_indices = @transform_3, window_bounds = array<i64: 8, 1>}, {transform_indices = @transform_4, window_bounds = array<i64: 1, 8, 256>}]} {
    %c0 = arith.constant 0 : index
    %c0_0 = arith.constant 0 : index
    %0 = vector.load %arg3[%c0, %c0_0] : memref<8x36xbf16, #tpu.memory_space<vmem>>, vector<8x36xbf16>
    %c0_1 = arith.constant 0 : index
    %c0_2 = arith.constant 0 : index
    %c0_3 = arith.constant 0 : index
    %1 = vector.load %arg2[%c0_1, %c0_2, %c0_3] : memref<1x36x256xbf16, #tpu.memory_space<vmem>>, vector<1x36x256xbf16>
    %2 = vector.shape_cast %1 : vector<1x36x256xbf16> to vector<36x256xbf16>
    %cst = arith.constant dense<0.000000e+00> : vector<8x256xf32>
    %3 = tpu.matmul %0, %2, %cst {dimension_numbers = #tpu.dot_dimension_numbers<[1], [0], [0], [1], [0, 0, 1, 1], [], []>} : vector<8x36xbf16>, vector<36x256xbf16>, vector<8x256xf32> -> vector<8x256xf32>
    %c0_4 = arith.constant 0 : index
    %c0_5 = arith.constant 0 : index
    %4 = vector.load %arg4[%c0_4, %c0_5] : memref<8x1xf32, #tpu.memory_space<vmem>>, vector<8x1xf32>
    %5 = vector.broadcast %4 : vector<8x1xf32> to vector<8x256xf32>
    %6 = arith.mulf %3, %5 : vector<8x256xf32>
    %c0_6 = arith.constant 0 : index
    %c0_7 = arith.constant 0 : index
    %7 = vector.load %arg5[%c0_6, %c0_7] : memref<8x1xf32, #tpu.memory_space<vmem>>, vector<8x1xf32>
    %8 = vector.broadcast %7 : vector<8x1xf32> to vector<8x256xf32>
    %9 = arith.addf %6, %8 : vector<8x256xf32>
    %cst_8 = arith.constant 0.000000e+00 : f32
    %10 = vector.broadcast %cst_8 : f32 to vector<8x256xf32>
    %11 = arith.maximumf %9, %10 : vector<8x256xf32>
    %c0_9 = arith.constant 0 : index
    %c0_10 = arith.constant 0 : index
    %c0_11 = arith.constant 0 : index
    %12 = vector.load %arg6[%c0_9, %c0_10, %c0_11] : memref<1x8x256xf32, #tpu.memory_space<vmem>>, vector<1x8x256xf32>
    %13 = vector.shape_cast %12 : vector<1x8x256xf32> to vector<8x256xf32>
    %14 = vector.shape_cast %11 : vector<8x256xf32> to vector<1x8x256xf32>
    tpu.vector_store %arg6[%c0_9, %c0_10, %c0_11], %14 {strides = array<i32>} : memref<1x8x256xf32, #tpu.memory_space<vmem>>, vector<1x8x256xf32>,
    return
  }
  func.func @transform_0(%arg0: i32, %arg1: i32) -> (i32, i32, i32) {
    %c0_i32 = arith.constant 0 : i32
    %c0_i32_0 = arith.constant 0 : i32
    return %arg0, %c0_i32, %arg1 : i32, i32, i32
  }
  func.func @transform_1(%arg0: i32, %arg1: i32) -> (i32, i32) {
    %c0_i32 = arith.constant 0 : i32
    %c0_i32_0 = arith.constant 0 : i32
    %c0_i32_1 = arith.constant 0 : i32
    return %c0_i32, %c0_i32_0 : i32, i32
  }
  func.func @transform_2(%arg0: i32, %arg1: i32) -> (i32, i32) {
    %c0_i32 = arith.constant 0 : i32
    %c0_i32_0 = arith.constant 0 : i32
    %c0_i32_1 = arith.constant 0 : i32
    return %c0_i32, %c0_i32_0 : i32, i32
  }
  func.func @transform_3(%arg0: i32, %arg1: i32) -> (i32, i32) {
    %c0_i32 = arith.constant 0 : i32
    %c0_i32_0 = arith.constant 0 : i32
    %c0_i32_1 = arith.constant 0 : i32
    return %c0_i32, %c0_i32_0 : i32, i32
  }
  func.func @transform_4(%arg0: i32, %arg1: i32) -> (i32, i32, i32) {
    %c0_i32 = arith.constant 0 : i32
    %c0_i32_0 = arith.constant 0 : i32
    return %arg0, %c0_i32, %arg1 : i32, i32, i32
  }
}

</mosaic_0001>

<bundles_post_ra>
// kernel: conv2d_bn_act.2
= control target key start
LH: loop header
LB: loop body
LE: loop exit
PB: predicated region body
PF: predicated region fallthrough
CT: control target
= control target key end

     0   :  { %s534_s12 = smov 0   ;;  %s536_s13 = smov 0   ;;  %s577_s0 = inlined_call_operand.vmem [shape: bf16[2,36,256], index: 0, kind: input, shape index: {}]   ;;  %s578_s1 = inlined_call_operand.vmem [shape: bf16[8,36], index: 1, kind: input, shape index: {}]   ;;  %s579_s2 = inlined_call_operand.vmem [shape: f32[2,1,8,1], index: 2, kind: output, shape index: {0}]   ;;  %s580_s3 = inlined_call_operand.vmem [shape: f32[2,1,8,1], index: 3, kind: output, shape index: {1}]  }
   0x1   :  { %s538_s14 = smov 0  }
   0x2 LB: > { %s26_s15 = sadd.s32 1, %s507_s13  ;;  %p441_p0 = scmp.ge.s32.totalorder %s511_s14, 1  ;;  %s511_s14 = sphi %s538_s14, %s14_s14   ;;  %s507_s13 = sphi %s536_s13, %s582_s13   ;;  %s503_s12 = sphi %s534_s12, %s581_s12  }
   0x3   : > { %p28_p1 = scmp.ge.s32.totalorder %s26_s15, 2  ;;  %p163_p2 = scmp.lt.s32.totalorder %s511_s14, 3 }
   0x5   : > { %s584_s15 = smov (%p28_p1, %s26_s15), 0  ;;  %p164_p3 = pnand %p441_p0, %p163_p2 }
   0x6   : > { %p201_p4 = scmp.lt.s32.totalorder (!%p164_p3), %s503_s12, 1 }
   0x7   : > { %167 = sbr.rel (%p164_p3) target bundleno = 371 (0x173), region = 28 }
   0xc   : > { %v513_v0 = vmov 0   ;;  %s586_s12 = smov (!%p201_p4, %s503_s12), 1  ;;  %vm260_vm0 = vcmask 1041408   ;;  %v225_v9 = vld [vmem:[%s578_s1] sm:$0xf]  ;;  %vm256_vm1 = vcmask 293888  }
   0xd   : > { %299 = vmatprep.mubr.bf16.mxu0 %v513_v0  ;;  %s455_s16 = smul.u32 40, %s586_s12  ;;  %s443_s22 = sshll.u32 %s586_s12, 3  ;;  %vm311_vm2 = vcmask 7168  }
   0xe   : > { %s216_s25 = scalar_lea.vmem %s579_s2, %s443_s22  ;;  %s223_s28 = scalar_lea.vmem %s580_s3, %s443_s22 }
   0xf   : > { %s208_s19 = scalar_lea.vmem %s577_s0, %s455_s16 }
  0x10   : > { %v230_v1 = vld [vmem:[%s208_s19 + $0x20] sm:$0x33]  ;;  %v483_v4 = vld [vmem:[%s208_s19 + $0x14] ss:$8 sps:$4 sm:$0xff]   ;;  %v485_v6 = vld [vmem:[%s208_s19 + $0x10] ss:$8 sps:$4 sm:$0xff]  }
  0x11   : > { %v450_v2 = vcombine.high %v230_v1, %v230_v1  ;;  %v449_v3 = vcombine.low %v230_v1, %v230_v1  ;;  %v486_v7 = vld [vmem:[%s208_s19 + $0x4] ss:$8 sps:$4 sm:$0xff]   ;;  %v488_v8 = vld [vmem:[%s208_s19] ss:$8 sps:$4 sm:$0xff]  }
  0x13   : > { %451 = vmatprep.subr.msk.bf16.mxu0 %vm260_vm0, %v450_v2  ;;  %v262_v5 = vsel %vm260_vm0, %v449_v3, 0 }
  0x14   : > { %278 = vmatpush1.bf16.msra.mxu0 %v262_v5 }
  0x15   : > { %279 = vmatprep.subr.bf16.mxu0 %v483_v4 }
  0x18   : > { %280 = vmatpush1.bf16.msra.mxu0 %v485_v6 }
  0x19   : > { %281 = vmatprep.subr.bf16.mxu0 %v486_v7 }
  0x1c   : > { %282 = vmatpush1.bf16.msra.mxu0 %v488_v8 }
  0x1f   : > { %452 = vmatmul.mubr.msk.bf16.vlgmr.msra.gmra.mxu0 %vm256_vm1, %v225_v9 }
  0xdf   : > { %v301_v10 = vpop.f32.mrf.mxu0 }
  0xe0   : > { %v313_v15 = vmul.f32 %v301_v10, %v301_v10 }
  0xe1   : > { %v303_v11 = vpop.f32.mrf.mxu0 }
  0xe2   : > { %v314_v12 = vmul.f32 %v303_v11, %v303_v11  ;;  %v308_v13 = vadd.f32 %v303_v11, %v301_v10 }
  0xe3   : > { %v305_v14 = vpop.f32.mrf.mxu0 }
  0xe4   : > { %309 = vadd.xlane.f32.xlu0 %v308_v13  ;;  %v315_v17 = vadd.f32 %v314_v12, %v313_v15 }
  0xe5   : > { %v306_v16 = vpop.f32.mrf.mxu0 }
  0xe8   : > { %316 = vadd.xlane.f32.xlu0 %v315_v17 }
 0x16d   : > { %v310_v18 = vpop.xlane.xlu0 %309 }
 0x16e   : > { %312 = vst.msk [vmem:[%s216_s25] sm:$0xff] %vm311_vm2, %v310_v18 }
 0x171   : > { %v317_v19 = vpop.xlane.xlu0 %316 }
 0x172   : > { %318 = vst.msk [vmem:[%s223_s28] sm:$0xff] %vm311_vm2, %v317_v19 }
 0x173 PF: > { %s14_s14 = sadd.s32 1, %s511_s14   ;;  %s581_s12 = smov %s507_s13 }
 0x174   : > { %p11_p5 = scmp.ge.s32.totalorder %s14_s14, 4   ;;  %s582_s13 = smov %s584_s15 }
 0x176   :  { %13 = sbr.rel (!%p11_p5) target bundleno = 2 (0x2), region = 70 }

// kernel: conv2d_bn_act.3
= control target key start
LH: loop header
LB: loop body
LE: loop exit
PB: predicated region body
PF: predicated region fallthrough
CT: control target
= control target key end

     0   :  { %s532_s15 = smov 0   ;;  %s534_s16 = smov 0   ;;  %s578_s0 = inlined_call_operand.vmem [shape: bf16[2,36,256], index: 0, kind: input, shape index: {}]   ;;  %s579_s1 = inlined_call_operand.vmem [shape: bf16[8,36], index: 1, kind: input, shape index: {}]   ;;  %s580_s2 = inlined_call_operand.vmem [shape: f32[8,1], index: 2, kind: input, shape index: {}]   ;;  %s581_s3 = inlined_call_operand.vmem [shape: f32[8,1], index: 3, kind: input, shape index: {}]   ;;  %s582_s4 = inlined_call_operand.vmem [shape: f32[2,8,256], index: 4, kind: output, shape index: {}]  }
   0x1   :  { %s536_s17 = smov 0  }
   0x2 LB: > { %s26_s18 = sadd.s32 1, %s500_s16  ;;  %p432_p0 = scmp.ge.s32.totalorder %s504_s17, 1  ;;  %s504_s17 = sphi %s536_s17, %s14_s17   ;;  %s500_s16 = sphi %s534_s16, %s584_s16   ;;  %s496_s15 = sphi %s532_s15, %s583_s15  }
   0x3   : > { %p28_p1 = scmp.ge.s32.totalorder %s26_s18, 2  ;;  %p183_p2 = scmp.lt.s32.totalorder %s504_s17, 3 }
   0x5   : > { %s586_s18 = smov (%p28_p1, %s26_s18), 0  ;;  %p184_p3 = pnand %p432_p0, %p183_p2 }
   0x6   : > { %p218_p4 = scmp.lt.s32.totalorder (!%p184_p3), %s496_s15, 1 }
   0x7   : > { %187 = sbr.rel (%p184_p3) target bundleno = 233 (0xe9), region = 36 }
   0xc   : > { %v506_v0 = vmov 0   ;;  %v321_v1 = vld [vmem:[%s580_s2] sm:$0xff]  ;;  %s588_s15 = smov (!%p218_p4, %s496_s15), 1  ;;  %vm273_vm0 = vcmask 1041408   ;;  %vm269_vm1 = vcmask 293888  }
   0xd   : > { %312 = vmatprep.mubr.bf16.mxu0 %v506_v0  ;;  %473 = vset.pattern.permute.xlu0 %v506_v0  ;;  %v329_v2 = vld [vmem:[%s581_s3] sm:$0xff]  ;;  %s447_s23 = smul.u32 40, %s588_s15  ;;  %s446_s29 = sshll.u32 %s588_s15, 4 }
   0xe   : > { %324 = vperm.xlu0 %473, %v321_v1   ;;  %v238_v11 = vld [vmem:[%s579_s1] sm:$0xf]  ;;  %s235_s6 = scalar_lea.vmem %s582_s4, %s446_s29 }
   0xf   : > { %s225_s26 = scalar_lea.vmem %s578_s0, %s447_s23 }
  0x10   : > { %v243_v3 = vld [vmem:[%s225_s26 + $0x20] sm:$0x33]  ;;  %v476_v6 = vld [vmem:[%s225_s26 + $0x14] ss:$8 sps:$4 sm:$0xff]   ;;  %v478_v8 = vld [vmem:[%s225_s26 + $0x10] ss:$8 sps:$4 sm:$0xff]  }
  0x11   : > { %v441_v4 = vcombine.high %v243_v3, %v243_v3  ;;  %v440_v5 = vcombine.low %v243_v3, %v243_v3  ;;  %v479_v9 = vld [vmem:[%s225_s26 + $0x4] ss:$8 sps:$4 sm:$0xff]   ;;  %v481_v10 = vld [vmem:[%s225_s26] ss:$8 sps:$4 sm:$0xff]  }
  0x12   : > { %332 = vperm.xlu0 %473, %v329_v2  }
  0x13   : > { %442 = vmatprep.subr.msk.bf16.mxu0 %vm273_vm0, %v441_v4  ;;  %v275_v7 = vsel %vm273_vm0, %v440_v5, 0 }
  0x14   : > { %291 = vmatpush1.bf16.msra.mxu0 %v275_v7 }
  0x15   : > { %292 = vmatprep.subr.bf16.mxu0 %v476_v6 }
  0x18   : > { %293 = vmatpush1.bf16.msra.mxu0 %v478_v8 }
  0x19   : > { %294 = vmatprep.subr.bf16.mxu0 %v479_v9 }
  0x1c   : > { %295 = vmatpush1.bf16.msra.mxu0 %v481_v10 }
  0x1f   : > { %443 = vmatmul.mubr.msk.bf16.vlgmr.msra.gmra.mxu0 %vm269_vm1, %v238_v11 }
  0x89   : > { %v325_v12 = vpop.permute.xlu0 %324 }
  0x8d   : > { %v333_v15 = vpop.permute.xlu0 %332 }
  0xdf   : > { %v314_v13 = vpop.f32.mrf.mxu0 }
  0xe0   : > { %v327_v14 = vmul.f32 %v325_v12, %v314_v13 }
  0xe1   : > { %v316_v16 = vpop.f32.mrf.mxu0 }
  0xe2   : > { %v335_v17 = vadd.f32 %v333_v15, %v327_v14  ;;  %v328_v18 = vmul.f32 %v325_v12, %v316_v16 }
  0xe3   : > { %v318_v19 = vpop.f32.mrf.mxu0 }
  0xe4   : > { %v337_v20 = vmax.f32 %v335_v17, 0.0  ;;  %v336_v21 = vadd.f32 %v333_v15, %v328_v18 }
  0xe5   : > { %v319_v22 = vpop.f32.mrf.mxu0 }
  0xe6   : > { %339 = vst [vmem:[%s235_s6] sm:$0xff] %v337_v20  ;;  %v338_v23 = vmax.f32 %v336_v21, 0.0 }
  0xe8   : > { %340 = vst [vmem:[%s235_s6 + $0x8] sm:$0xff] %v338_v23 }
  0xe9 PF: > { %s14_s17 = sadd.s32 1, %s504_s17   ;;  %s583_s15 = smov %s500_s16 }
  0xea   : > { %p11_p5 = scmp.ge.s32.totalorder %s14_s17, 4   ;;  %s584_s16 = smov %s586_s18 }
  0xec   :  { %13 = sbr.rel (!%p11_p5) target bundleno = 2 (0x2), region = 66 }

</bundles_post_ra>
